<compile_context>
chip_gen: v7x
topology: tpu7x:2x2x1
jax: 0.10.0
libtpu: 0.0.40
codegen_flags: <defaults>
</compile_context>

<pallas_src>
import functools

import jax
import jax.numpy as jnp
from jax import lax
from jax.experimental import pallas as pl
from jax.experimental.pallas import tpu as pltpu


def _round_up(x, mult):
    return ((x + mult - 1) // mult) * mult


def _koop_kernel(xu_ref, w_ref, o_ref, *, k_pad, n, nr):
    """out = [ XU @ AB^T  |  (XU @ AB^T) @ C2^T ]  in one VMEM pass."""
    dn = (((1,), (0,)), ((), ()))  # contract lhs axis 1 with rhs axis 0 (x @ W)

    xu = xu_ref[...]                                 # (batch, k_pad)

    ab_t = w_ref[0:k_pad, :]                         # (k_pad, n), aligned rows
    out1 = lax.dot_general(xu, ab_t, dn,
                           preferred_element_type=jnp.float32)   # (batch, n)

    c2_t = w_ref[k_pad:k_pad + n, 0:nr]              # (n, nr), aligned row start
    out23 = lax.dot_general(out1, c2_t, dn,
                            preferred_element_type=jnp.float32)  # (batch, nr)

    o_ref[:, 0:n] = out1.astype(o_ref.dtype)
    o_ref[:, n:n + nr] = out23.astype(o_ref.dtype)


def pack_koop_params(A_w, B_w, C, C_1):
    """One-time weight prep: transpose + concat + pad into a single VMEM slab."""
    A_w = jnp.asarray(A_w, jnp.float32)              # (n, n)
    B_w = jnp.asarray(B_w, jnp.float32)              # (n, m)
    C = jnp.asarray(C, jnp.float32)                  # (n_normal, n)
    C_1 = jnp.asarray(C_1, jnp.float32)              # (real_output, n)

    n, m = A_w.shape[0], B_w.shape[1]
    n_normal, real_output = C.shape[0], C_1.shape[0]
    nr = n_normal + real_output
    k = n + m
    k_pad = _round_up(k, 8)                          # sublane-align AB^T block

    # AB^T: (k_pad, n); zero rows pair with zero-padded XU columns (no-op math).
    ab_t = jnp.concatenate([A_w, B_w], axis=1).T     # (k, n)
    ab_t = jnp.pad(ab_t, ((0, k_pad - k), (0, 0)))   # (k_pad, n)

    # C2^T: (n, nr), zero-padded in lanes so both blocks share one slab width.
    c2_t = jnp.concatenate([C, C_1], axis=0).T       # (n, nr)
    c2_t = jnp.pad(c2_t, ((0, 0), (0, n - nr)))      # (n, n)

    w_slab = jnp.concatenate([ab_t, c2_t], axis=0)   # (k_pad + n, n)
    dims = dict(n=n, m=m, n_normal=n_normal, real_output=real_output,
                k=k, k_pad=k_pad, nr=nr)
    return w_slab, dims


def koop_forward(X1, U, packed_params):
    w_slab, d = packed_params
    n, n_normal, real_output = d["n"], d["n_normal"], d["real_output"]
    k, k_pad, nr = d["k"], d["k_pad"], d["nr"]

    batch = X1.shape[0]
    X1 = jnp.asarray(X1, jnp.float32)
    U = jnp.asarray(U, jnp.float32)

    # Single fused activation operand [X1 | U | 0-pad] -> (batch, k_pad).
    xu = jnp.concatenate(
        [X1, U, jnp.zeros((batch, k_pad - k), jnp.float32)], axis=1)

    vmem = pl.BlockSpec(memory_space=pltpu.MemorySpace.VMEM)
    out_width = n + nr

    flops = 2 * batch * k_pad * n + 2 * batch * n * nr
    bytes_accessed = 4 * (int(xu.size) + int(w_slab.size) + batch * out_width)

    out = pl.pallas_call(
        functools.partial(_koop_kernel, k_pad=k_pad, n=n, nr=nr),
        out_shape=jax.ShapeDtypeStruct((batch, out_width), jnp.float32),
        in_specs=[vmem, vmem],
        out_specs=vmem,
        cost_estimate=pl.CostEstimate(
            flops=flops, transcendentals=0, bytes_accessed=bytes_accessed),
    )(xu, w_slab)

    output_1 = out[:, :n]
    output_2 = out[:, n:n + n_normal]
    output_3 = out[:, n + n_normal:n + n_normal + real_output]
    return output_1, output_2, output_3


if __name__ == "__main__":
    # Shapes implied by the surrounding code: original state dim n_normal = 4,
    # liftFun adds 6 rows -> lifted dim 10, n = 10 + encode_dim(30) = 40,
    # m = control dim (small), real_output = 2.
    batch, n, m, n_normal, real_output = 8, 40, 2, 4, 2

    key = jax.random.PRNGKey(0)
    k1, k2 = jax.random.split(key)
    X1 = jax.random.normal(k1, (batch, n), dtype=jnp.float32)
    U = jax.random.normal(k2, (batch, m), dtype=jnp.float32)

    # Deterministic parameters exactly as koop_model.__init__ sets them.
    A_w = 0.1 * jnp.eye(n, dtype=jnp.float32)                  # A.weight
    B_w = jnp.ones((n, m), dtype=jnp.float32)                  # B.weight
    C = jnp.concatenate(
        [jnp.eye(n_normal, dtype=jnp.float32),
         jnp.zeros((n_normal, n - n_normal), dtype=jnp.float32)], axis=1)
    C_1 = jnp.concatenate(
        [jnp.eye(real_output, dtype=jnp.float32),
         jnp.zeros((real_output, n - real_output), dtype=jnp.float32)], axis=1)

    packed = pack_koop_params(A_w, B_w, C, C_1)
    out1, out2, out3 = jax.block_until_ready(koop_forward(X1, U, packed))

    # Pure-JAX reference check (same math as the PyTorch forward).
    ref1 = X1 @ A_w.T + U @ B_w.T
    ref2 = ref1 @ C.T
    ref3 = ref1 @ C_1.T
    assert out1.shape == (batch, n)
    assert out2.shape == (batch, n_normal)
    assert out3.shape == (batch, real_output)
    assert jnp.allclose(out1, ref1, atol=1e-5, rtol=1e-5)
    assert jnp.allclose(out2, ref2, atol=1e-5, rtol=1e-5)
    assert jnp.allclose(out3, ref3, atol=1e-5, rtol=1e-5)

    print("KERNEL_OK")
</pallas_src>

<mosaic_0001>
module attributes {stable_mosaic.version = 11 : i64} {
  func.func @_koop_kernel(%arg0: memref<8x48xf32, #tpu.memory_space<vmem>>, %arg1: memref<88x40xf32, #tpu.memory_space<vmem>>, %arg2: memref<8x46xf32, #tpu.memory_space<vmem>>) attributes {dimension_semantics = [], scalar_prefetch = 0 : i64, scratch_operands = 0 : i64, tpu.core_type = #tpu.core_type<tc>} {
    %c0 = arith.constant 0 : index
    %c0_0 = arith.constant 0 : index
    %0 = vector.load %arg0[%c0, %c0_0] : memref<8x48xf32, #tpu.memory_space<vmem>>, vector<8x48xf32>
    %c0_1 = arith.constant 0 : index
    %c0_2 = arith.constant 0 : index
    %1 = vector.load %arg1[%c0_1, %c0_2] : memref<88x40xf32, #tpu.memory_space<vmem>>, vector<48x40xf32>
    %cst = arith.constant dense<0.000000e+00> : vector<8x40xf32>
    %2 = tpu.matmul %0, %1, %cst {dimension_numbers = #tpu.dot_dimension_numbers<[1], [0], [0], [1], [0, 0, 1, 1], [], []>} : vector<8x48xf32>, vector<48x40xf32>, vector<8x40xf32> -> vector<8x40xf32>
    %c48 = arith.constant 48 : index
    %c0_3 = arith.constant 0 : index
    %3 = vector.load %arg1[%c48, %c0_3] : memref<88x40xf32, #tpu.memory_space<vmem>>, vector<40x6xf32>
    %cst_4 = arith.constant dense<0.000000e+00> : vector<8x6xf32>
    %4 = tpu.matmul %2, %3, %cst_4 {dimension_numbers = #tpu.dot_dimension_numbers<[1], [0], [0], [1], [0, 0, 1, 1], [], []>} : vector<8x40xf32>, vector<40x6xf32>, vector<8x6xf32> -> vector<8x6xf32>
    %c0_5 = arith.constant 0 : index
    %c0_6 = arith.constant 0 : index
    %5 = vector.load %arg2[%c0_5, %c0_6] : memref<8x46xf32, #tpu.memory_space<vmem>>, vector<8x40xf32>
    tpu.vector_store %arg2[%c0_5, %c0_6], %2 {strides = array<i32>} : memref<8x46xf32, #tpu.memory_space<vmem>>, vector<8x40xf32>,
    %c0_7 = arith.constant 0 : index
    %c40 = arith.constant 40 : index
    %6 = vector.load %arg2[%c0_7, %c40] : memref<8x46xf32, #tpu.memory_space<vmem>>, vector<8x6xf32>
    tpu.vector_store %arg2[%c0_7, %c40], %4 {strides = array<i32>} : memref<8x46xf32, #tpu.memory_space<vmem>>, vector<8x6xf32>,
    return
  }
}

</mosaic_0001>

<bundles_post_ra>
// kernel: tpu_custom_call.1
= control target key start
LH: loop header
LB: loop body
LE: loop exit
PB: predicated region body
PF: predicated region fallthrough
CT: control target
= control target key end

     0   :  { %v280_v3 = vmov 0.0|0.0   ;;  %vm281_vm0 = vmmov 0   ;;  %v282_v6 = vmov 0.0   ;;  %s348_s0 = inlined_call_operand.vmem [shape: f32[8,48], index: 0, kind: input, shape index: {}]   ;;  %s349_s1 = inlined_call_operand.vmem [shape: f32[88,40], index: 1, kind: input, shape index: {}]   ;;  %s350_s2 = inlined_call_operand.hbm [shape: f32[8,46], index: 2, kind: output, shape index: {}]  }
   0x1   :  { %v13_v0 = vld [vmem:[%s349_s1] sm:$0xff]  ;;  %v14_v1 = vld [vmem:[%s349_s1 + $0x8] sm:$0xff]  ;;  %v15_v2 = vld [vmem:[%s349_s1 + $0x10] sm:$0xff]  ;;  %236 = vmatprep.subr.bf16.mxu0 %v280_v3  ;;  %220 = vmatprep.mubr.msk.f32.mxu0 %vm281_vm0, %v282_v6 }
   0x2   :  { %v237_v4 = vpack.c.bf16 %v14_v1, %v13_v0  ;;  %v16_v5 = vld [vmem:[%s349_s1 + $0x18] sm:$0xff]  ;;  %245 = vmatprep.subr.bf16.mxu1 %v280_v3  ;;  %v93_v7 = vld [vmem:[%s349_s1 + $0x30] sm:$0xff]  ;;  %233 = vmatprep.mubr.msk.f32.mxu1 %vm281_vm0, %v282_v6  ;;  %v95_v11 = vld [vmem:[%s349_s1 + $0x40] sm:$0xff] }
   0x3   :  { %v94_v8 = vld [vmem:[%s349_s1 + $0x38] sm:$0xff]  ;;  %v240_v9 = vpack.c.bf16 %v16_v5, %v15_v2  ;;  %v96_v12 = vld [vmem:[%s349_s1 + $0x48] sm:$0xff] }
   0x4   :  { %238 = vmatpush3.bf16.msra.mxu0 %v237_v4  ;;  %v246_v10 = vpack.c.bf16 %v94_v8, %v93_v7 }
   0x5   :  { %7 = vsyncpa [#allocation3], 0  ;;  %239 = vmatprep.subr.bf16.mxu0 %v280_v3  ;;  %v17_v13 = vld [vmem:[%s349_s1 + $0x20] sm:$0xff]  ;;  %v18_v14 = vld [vmem:[%s349_s1 + $0x28] sm:$0xff]  ;;  %v249_v15 = vpack.c.bf16 %v96_v12, %v95_v11  ;;  %vm19_vm1 = vcmask 392192   ;;  %vm98_vm2 = vcmask 326656  }
   0x6   :  { %247 = vmatpush3.bf16.msra.mxu1 %v246_v10  ;;  %v243_v16 = vpack.c.bf16 %v18_v14, %v17_v13  ;;  %v12_v17 = vld [vmem:[%s348_s0] sm:$0xff]  ;;  %v97_v18 = vld [vmem:[%s349_s1 + $0x50] sm:$0xff]  ;;  %s283_s5 = smov 40   ;;  %s284_s6 = smov [#allocation2]   ;;  %vm177_vm3 = vcmask 376128  }
   0x7   :  { %248 = vmatprep.subr.bf16.mxu1 %v280_v3  ;;  %s185_s7 = sshll.u32 %s284_s6, 4  ;;  %s186_s7 = int_to_ptr.vmem [resolvable:$true] %s185_s7 }
   0x8   :  { %241 = vmatpush3.bf16.msra.mxu0 %v240_v9  ;;  %s256_s0 = scalar_lea.vmem %s186_s7, 128  ;;  %p261_p1 = scmp.lt.s32.totalorder %s186_s7, %s186_s7 }
   0x9   :  { %242 = vmatprep.subr.bf16.mxu0 %v280_v3  ;;  %p257_p0 = scmp.ne.s32.totalorder %s186_s7, %s256_s0  ;;  %p262_p2 = scmp.lt.s32.totalorder %s256_s0, %s256_s0 }
   0xa   :  { %250 = vmatpush3.bf16.msra.mxu1 %v249_v15 }
   0xb   :  { %231 = vmatprep.subr.mxu1 %v282_v6  ;;  %p263_p3 = por %p262_p2, %p261_p1 }
   0xc   :  { %244 = vmatpush3.bf16.msra.mxu0 %v243_v16 }
   0xd   :  { %p264_p4 = pnand %p263_p3, %p257_p0 }
   0xe   :  { %232 = vmatpush3.msra.mxu1 %v97_v18 }
   0xf   :  { %221 = vmatmul.mubr.msk.f32.vlgmr.msra.gmra.mrb[0].mxu0 %vm19_vm1, %v12_v17 }
  0xe2   :  { %v89_v19 = vpop.f32.mrb[0].mxu0 }
  0xe3   :  { %172 = vst.msk [vmem:[#allocation2] sm:$0xff] %vm98_vm2, %v89_v19  ;;  %v222_v20 = vpop.f32.mrb[1].mxu0  ;;  %234 = vmatmul.mubr.msk.f32.vlgmr.msra.gmra.mrb[0].mxu1 %vm98_vm2, %v89_v19 }
 0x1b6   :  { %v168_v21 = vpop.f32.mrb[0].mxu1 }
 0x1b7   :  { %v235_v22 = vpop.f32.mrb[1].mxu1  ;;  %174 = vrot.lane.b32.xlu0 %v168_v21, %s283_s5 }
 0x229   :  { %v175_v23 = vpop.permute.xlu0 %174 }
 0x22a   :  { %178 = vst.msk [vmem:[#allocation2] sm:$0xff] %vm177_vm3, %v175_v23 }
 0x22b   :  { %267 = shalt.err (!%p264_p4)
}
 0x22c   :  { %s268_s9 = scalar_lea.hbm %s350_s2, 128 }
 0x22d   :  { %p269_p5 = scmp.ne.s32.totalorder %s350_s2, %s268_s9  ;;  %p272_p6 = scmp.lt.u32.totalorder %s268_s9, %s350_s2 }
 0x22f   :  { %p274_p7 = pnand %p272_p6, %p269_p5 }
 0x231   :  { %277 = shalt.err (!%p274_p7)
}
 0x232   :  { %188 = dma.vmem_to_hbm [thread:$0]  %s186_s7, 128, %s350_s2, [#allocation3]  }
 0x233   :  { %278 = dma.done.wait [#allocation3], 128  }
 0x234   :  { %279 = vsyncadd [#allocation3], 4294967168 }
 0x235   :  { %192 = vsyncpa [#allocation3], 1 }

</bundles_post_ra>
